<compile_context>
chip_gen: v7x
topology: tpu7x:2x2x1
jax: 0.10.0
libtpu: 0.0.40
codegen_flags: <defaults>
</compile_context>

<pallas_src>
import functools

import jax
import jax.numpy as jnp
from jax.experimental import pallas as pl
from jax.experimental.pallas import tpu as pltpu


# --------------------------------------------------------------------------- #
# Kernel 1 (tiny, gridless): adaptive adjacency + node-adaptive bias, computed once.
# --------------------------------------------------------------------------- #
def supports_bias_kernel(e_ref, bpool_ref, supports_ref, bias_ref):
    E = e_ref[...].astype(jnp.float32)                            # [N, D]
    A = jnp.dot(E, E.T, preferred_element_type=jnp.float32)       # [N, N]
    A = jnp.maximum(A, 0.0)
    A = A - jnp.max(A, axis=1, keepdims=True)                     # stabilized softmax
    expA = jnp.exp(A)
    denom = jnp.sum(expA, axis=1, keepdims=True)
    # approx=True would push this onto the EUP but perturbs results beyond 1e-4.
    supports_ref[...] = expA * pl.reciprocal(denom, approx=False)
    bias_ref[...] = jnp.dot(E, bpool_ref[...].astype(jnp.float32),
                            preferred_element_type=jnp.float32)   # [N, Co]


# --------------------------------------------------------------------------- #
# Main kernel: Chebyshev propagation + (k, i, d) contraction, grid over batch tiles.
# --------------------------------------------------------------------------- #
def _reduce_embed_groups(P, embed_dim, dim_out):
    """Sum the D groups of Co lanes of P [rows, D*Co] -> [rows, Co]."""
    if embed_dim == 1:
        return P
    if (embed_dim & (embed_dim - 1)) == 0 and (embed_dim * dim_out) % 128 == 0:
        # Production path: log2(D) cyclic XLU rolls + full-width VPU adds keep the
        # reduction entirely on the lane axis (every Co group ends with the full sum).
        step = embed_dim // 2
        while step >= 1:
            P = P + pltpu.roll(P, shift=step * dim_out, axis=1)
            step //= 2
        return P[:, :dim_out]
    # Small / non-lane-aligned D (e.g. this toy test): reshape-sum.
    return P.reshape(P.shape[0], embed_dim, dim_out).sum(axis=1)


def avwgcn_kernel(supports_ref, x_ref, wpool_ref, ebcast_ref, bias_ref, out_ref, *,
                  cheb_k, batch_tile, dim_in, dim_out, embed_dim):
    S = supports_ref[...]                              # [N, N]      (resident)
    X = x_ref[...].astype(jnp.float32)                 # [N, Bt*Ci]  (batch-tile cols)

    # Chebyshev recursion applied to the features, batched over the tile columns:
    # one [N,N] @ [N,Bt*Ci] matmul per order k (k = 0 identity term is X itself).
    terms = [X]
    if cheb_k >= 2:
        terms.append(jnp.dot(S, X, preferred_element_type=jnp.float32))
        for _ in range(2, cheb_k):
            terms.append(
                2.0 * jnp.dot(S, terms[-1], preferred_element_type=jnp.float32)
                - terms[-2])

    W = wpool_ref[...]                                 # [K*Ci, D*Co] (resident)
    EB = ebcast_ref[...]                               # [N, D*Co]    (resident)
    bias = bias_ref[...]                               # [N, Co]      (resident)

    outs = []
    for b in range(batch_tile):                        # small static loop within tile
        lo = b * dim_in
        # k-major, i-minor packing matches the [K*Ci, D*Co] packed weights.
        xg_b = jnp.concatenate([t[:, lo:lo + dim_in] for t in terms], axis=-1)
        T = jnp.dot(xg_b, W, preferred_element_type=jnp.float32)   # [N, D*Co]
        red = _reduce_embed_groups(EB * T, embed_dim, dim_out)     # [N, Co]
        outs.append(red + bias)

    # One lane-packed store per tile ([N, Bt*Co]); wrapper unpacks to [B, N, Co].
    out_ref[...] = jnp.concatenate(outs, axis=-1).astype(out_ref.dtype)


# --------------------------------------------------------------------------- #
# Wrapper
# --------------------------------------------------------------------------- #
def _pick_batch_tile(B, Ci, Co):
    # Smallest batch tile keeping both x and out column blocks lane-aligned (x128);
    # otherwise fall back to the whole batch (block == full array dims, always legal).
    for bt in range(1, B + 1):
        if B % bt == 0 and (bt * Ci) % 128 == 0 and (bt * Co) % 128 == 0:
            return bt
    return B


def _vmem_limit_bytes(N, Ci, Co, D, K, bt):
    f32 = 4
    resident = (N * N + K * Ci * D * Co + N * D * Co + N * Co) * f32
    streamed = 2 * (N * bt * Ci + N * bt * Co) * f32               # double-buffered tiles
    live = (3 * N * bt * Ci + N * (D * Co + K * Ci + bt * Co)) * f32
    est = resident + streamed + live
    # Explicit limit with headroom; clamp below v7x's 64 MiB physical VMEM.
    return int(min(max(2 * est + (8 << 20), 32 << 20), 60 << 20))


def avwgcn(x, node_embeddings, weights_pool, bias_pool, cheb_k, *, batch_tile=None):
    B, N, Ci = x.shape
    D, K, Ci2, Co = weights_pool.shape
    assert K == cheb_k and Ci2 == Ci
    assert node_embeddings.shape == (N, D) and bias_pool.shape == (D, Co)

    f32 = jnp.float32
    E = node_embeddings.astype(f32)

    # ---- kernel 1: supports & bias, computed once ----------------------------
    supports, bias = pl.pallas_call(
        supports_bias_kernel,
        out_shape=(jax.ShapeDtypeStruct((N, N), f32),
                   jax.ShapeDtypeStruct((N, Co), f32)),
        in_specs=[pl.BlockSpec(memory_space=pltpu.MemorySpace.VMEM)] * 2,
        out_specs=(pl.BlockSpec(memory_space=pltpu.MemorySpace.VMEM),) * 2,
        compiler_params=pltpu.CompilerParams(
            vmem_limit_bytes=int(min(max(6 * N * N * 4 + (8 << 20), 32 << 20), 60 << 20))),
    )(E, bias_pool.astype(f32))

    # ---- wrapper-side layout plumbing (free) ---------------------------------
    #   x            -> [N, B*Ci]   column layout (batch folded into MXU RHS lanes)
    #   weights_pool -> [K*Ci, D*Co] with W[k*Ci+i, d*Co+o] = pool[d, k, i, o]
    #   E_bcast      -> [N, D*Co]   E_bcast[n, d*Co+o] = E[n, d]
    x_cols = jnp.transpose(x, (1, 0, 2)).reshape(N, B * Ci).astype(f32)
    wpool_mat = jnp.transpose(weights_pool, (1, 2, 0, 3)).reshape(K * Ci, D * Co).astype(f32)
    e_bcast = jnp.repeat(E, Co, axis=1)                                  # [N, D*Co]

    bt = _pick_batch_tile(B, Ci, Co) if batch_tile is None else batch_tile
    assert B % bt == 0
    grid = (B // bt,)

    kernel = functools.partial(avwgcn_kernel, cheb_k=cheb_k, batch_tile=bt,
                               dim_in=Ci, dim_out=Co, embed_dim=D)
    out_cols = pl.pallas_call(
        kernel,
        out_shape=jax.ShapeDtypeStruct((N, B * Co), x.dtype),
        grid=grid,
        in_specs=[
            pl.BlockSpec((N, N), lambda b: (0, 0)),             # supports (resident)
            pl.BlockSpec((N, bt * Ci), lambda b: (0, b)),       # x batch-tile columns
            pl.BlockSpec((K * Ci, D * Co), lambda b: (0, 0)),   # packed weights_pool
            pl.BlockSpec((N, D * Co), lambda b: (0, 0)),        # E broadcast over Co
            pl.BlockSpec((N, Co), lambda b: (0, 0)),            # node-adaptive bias
        ],
        out_specs=pl.BlockSpec((N, bt * Co), lambda b: (0, b)),
        compiler_params=pltpu.CompilerParams(
            dimension_semantics=("parallel",),                  # v7x: shard tiles on 2 TCs
            vmem_limit_bytes=_vmem_limit_bytes(N, Ci, Co, D, K, bt)),
    )(supports, x_cols, wpool_mat, e_bcast, bias)

    # [N, B*Co] -> [B, N, Co] (wrapper-side unpack of the lane-packed output slab).
    return out_cols.reshape(N, B, Co).transpose(1, 0, 2)


def avwgcn_ref(x, E, weights_pool, bias_pool, cheb_k):
    """Pure-JAX reference mirroring the PyTorch forward exactly."""
    N = E.shape[0]
    A = jnp.maximum(E @ E.T, 0.0)
    supports = jax.nn.softmax(A, axis=1)
    support_set = [jnp.eye(N, dtype=x.dtype), supports]
    for _ in range(2, cheb_k):
        support_set.append(2.0 * supports @ support_set[-1] - support_set[-2])
    S = jnp.stack(support_set, axis=0)                            # [K, N, N]
    weights = jnp.einsum('nd,dkio->nkio', E, weights_pool)        # [N, K, Ci, Co]
    bias = E @ bias_pool                                          # [N, Co]
    x_g = jnp.einsum('knm,bmc->bknc', S, x)                       # [B, K, N, Ci]
    x_g = jnp.transpose(x_g, (0, 2, 1, 3))                        # [B, N, K, Ci]
    return jnp.einsum('bnki,nkio->bno', x_g, weights) + bias      # [B, N, Co]


if __name__ == "__main__":
    # Shapes implied by the module: dim_in=4, dim_out=8, cheb_k=3, embed_dim=8
    B, N, Ci, Co, K, D = 2, 16, 4, 8, 3, 8

    key = jax.random.PRNGKey(0)
    kx, ke, kw, kb = jax.random.split(key, 4)
    x = jax.random.normal(kx, (B, N, Ci), dtype=jnp.float32)
    node_embeddings = jax.random.normal(ke, (N, D), dtype=jnp.float32) * 0.5
    weights_pool = jax.random.normal(kw, (D, K, Ci, Co), dtype=jnp.float32) * 0.1
    bias_pool = jax.random.normal(kb, (D, Co), dtype=jnp.float32) * 0.1

    out = avwgcn(x, node_embeddings, weights_pool, bias_pool, cheb_k=K)
    out = jax.block_until_ready(out)

    ref = jax.block_until_ready(avwgcn_ref(x, node_embeddings, weights_pool, bias_pool, K))

    assert out.shape == (B, N, Co), out.shape
    max_err = float(jnp.max(jnp.abs(out - ref)))
    assert jnp.allclose(out, ref, atol=1e-4, rtol=1e-4), max_err
    print("KERNEL_OK")
</pallas_src>

<mosaic_0001>
module attributes {stable_mosaic.version = 11 : i64} {
  func.func @supports_bias_kernel(%arg0: memref<16x8xf32, #tpu.memory_space<vmem>>, %arg1: memref<8x8xf32, #tpu.memory_space<vmem>>, %arg2: memref<16x16xf32, #tpu.memory_space<vmem>>, %arg3: memref<16x8xf32, #tpu.memory_space<vmem>>) attributes {dimension_semantics = [], scalar_prefetch = 0 : i64, scratch_operands = 0 : i64, tpu.core_type = #tpu.core_type<tc>} {
    %c0 = arith.constant 0 : index
    %c0_0 = arith.constant 0 : index
    %0 = vector.load %arg0[%c0, %c0_0] : memref<16x8xf32, #tpu.memory_space<vmem>>, vector<16x8xf32>
    %1 = tpu.transpose %0, [1, 0] : vector<16x8xf32> -> vector<8x16xf32>
    %cst = arith.constant dense<0.000000e+00> : vector<16x16xf32>
    %2 = tpu.matmul %0, %1, %cst {dimension_numbers = #tpu.dot_dimension_numbers<[1], [0], [0], [1], [0, 0, 1, 1], [], []>} : vector<16x8xf32>, vector<8x16xf32>, vector<16x16xf32> -> vector<16x16xf32>
    %cst_1 = arith.constant 0.000000e+00 : f32
    %3 = vector.broadcast %cst_1 : f32 to vector<16x16xf32>
    %4 = arith.maximumf %2, %3 : vector<16x16xf32>
    %cst_2 = arith.constant dense<0xFF800000> : vector<16xf32>
    %5 = vector.multi_reduction <maximumf>, %4, %cst_2 [1] : vector<16x16xf32> to vector<16xf32>
    %6 = vector.shape_cast %5 : vector<16xf32> to vector<16x1xf32>
    %7 = vector.broadcast %6 : vector<16x1xf32> to vector<16x16xf32>
    %8 = arith.subf %4, %7 : vector<16x16xf32>
    %9 = math.exp %8 : vector<16x16xf32>
    %cst_3 = arith.constant dense<0.000000e+00> : vector<16xf32>
    %10 = vector.multi_reduction <add>, %9, %cst_3 [1] : vector<16x16xf32> to vector<16xf32>
    %11 = vector.shape_cast %10 : vector<16xf32> to vector<16x1xf32>
    %12 = tpu.reciprocal %11 : vector<16x1xf32> -> vector<16x1xf32>
    %13 = vector.broadcast %12 : vector<16x1xf32> to vector<16x16xf32>
    %14 = arith.mulf %9, %13 : vector<16x16xf32>
    %c0_4 = arith.constant 0 : index
    %c0_5 = arith.constant 0 : index
    %15 = vector.load %arg2[%c0_4, %c0_5] : memref<16x16xf32, #tpu.memory_space<vmem>>, vector<16x16xf32>
    tpu.vector_store %arg2[%c0_4, %c0_5], %14 {strides = array<i32>} : memref<16x16xf32, #tpu.memory_space<vmem>>, vector<16x16xf32>,
    %c0_6 = arith.constant 0 : index
    %c0_7 = arith.constant 0 : index
    %16 = vector.load %arg1[%c0_6, %c0_7] : memref<8x8xf32, #tpu.memory_space<vmem>>, vector<8x8xf32>
    %cst_8 = arith.constant dense<0.000000e+00> : vector<16x8xf32>
    %17 = tpu.matmul %0, %16, %cst_8 {dimension_numbers = #tpu.dot_dimension_numbers<[1], [0], [0], [1], [0, 0, 1, 1], [], []>} : vector<16x8xf32>, vector<8x8xf32>, vector<16x8xf32> -> vector<16x8xf32>
    %c0_9 = arith.constant 0 : index
    %c0_10 = arith.constant 0 : index
    %18 = vector.load %arg3[%c0_9, %c0_10] : memref<16x8xf32, #tpu.memory_space<vmem>>, vector<16x8xf32>
    tpu.vector_store %arg3[%c0_9, %c0_10], %17 {strides = array<i32>} : memref<16x8xf32, #tpu.memory_space<vmem>>, vector<16x8xf32>,
    return
  }
}

</mosaic_0001>

<bundles_post_ra>
// kernel: tpu_custom_call.1
= control target key start
LH: loop header
LB: loop body
LE: loop exit
PB: predicated region body
PF: predicated region fallthrough
CT: control target
= control target key end

     0   :  { %vm16_vm0 = vcmask 64512   ;;  %s353_s0 = inlined_call_operand.vmem [shape: f32[16,8], index: 0, kind: input, shape index: {}]   ;;  %s354_s1 = inlined_call_operand.vmem [shape: f32[8,8], index: 1, kind: input, shape index: {}]   ;;  %s355_s2 = inlined_call_operand.hbm [shape: f32[16,16], index: 2, kind: output, shape index: {0}]   ;;  %s356_s3 = inlined_call_operand.vmem [shape: f32[16,8], index: 3, kind: output, shape index: {1}]  }
   0x1   :  { %v14_v0 = vld [vmem:[%s353_s0] sm:$0xff]  ;;  %v15_v1 = vld [vmem:[%s353_s0 + $0x8] sm:$0xff] }
   0x2   :  { %9 = vsyncpa [#allocation3], 0  ;;  %v248_v2 = vpack.c.bf16 %v15_v1, %v14_v0  ;;  %240 = vmatprep.mubr.msk.f32.mxu0 %vm16_vm0, %v14_v0  ;;  %245 = vmatprep.mubr.msk.f32.mxu1 %vm16_vm0, %v14_v0  ;;  %v125_v3 = vld [vmem:[%s354_s1] sm:$0xff]  ;;  %vm100_vm2 = vcmask 130048   ;;  %s289_s20 = smov [#allocation2]  }
   0x3   :  { %vm249_vm1 = vmpackc.low %vm16_vm0, %vm16_vm0  ;;  %243 = vmatprep.subr.mxu1 %v125_v3  ;;  %s208_s21 = sshll.u32 %s289_s20, 4  ;;  %s209_s21 = int_to_ptr.vmem [resolvable:$true] %s208_s21 }
   0x4   :  { %250 = vmatprep.subr.msk.bf16.mxu0 %vm249_vm1, %v248_v2  ;;  %244 = vmatpush3.msra.mxu1 %v125_v3  ;;  %s265_s22 = scalar_lea.vmem %s209_s21, 256  ;;  %p270_p1 = scmp.lt.s32.totalorder %s209_s21, %s209_s21 }
   0x5   :  { %253 = vmatpush3.bf16.xpose.msk.msra.mxu0 %vm249_vm1, %v248_v2  ;;  %246 = vmatmul.mubr.msk.f32.vlgmr.msra.gmra.mrb[0].mxu1 %vm16_vm0, %v15_v1  ;;  %p266_p0 = scmp.ne.s32.totalorder %s209_s21, %s265_s22  ;;  %p271_p2 = scmp.lt.s32.totalorder %s265_s22, %s265_s22 }
   0x7   :  { %p272_p3 = por %p271_p2, %p270_p1 }
   0x9   :  { %p273_p4 = pnand %p272_p3, %p266_p0 }
   0xc   :  { %241 = vmatmul.mubr.msk.f32.vlgmr.msra.gmra.mrb[0].mxu0 %vm16_vm0, %v15_v1 }
  0xd8   :  { %v247_v20 = vpop.f32.mrb[0].mxu1 }
  0xd9   :  { %202 = vst.msk [vmem:[%s356_s3 + $0x8] sm:$0xff] %vm16_vm0, %v247_v20  ;;  %v192_v21 = vpop.f32.mrb[1].mxu1 }
  0xda   :  { %201 = vst.msk [vmem:[%s356_s3] sm:$0xff] %vm16_vm0, %v192_v21 }
  0xdf   :  { %v242_v4 = vpop.f32.mrb[0].mxu0 }
  0xe0   :  { %v89_v5 = vpop.f32.mrb[1].mxu0  ;;  %v99_v7 = vmax.f32 %v242_v4, 0.0 }
  0xe1   :  { %v98_v6 = vmax.f32 %v89_v5, 0.0 }
  0xe2   :  { %v104_v9 = vsel %vm100_vm2, %v99_v7, -inf }
  0xe3   :  { %v101_v8 = vsel %vm100_vm2, %v98_v6, -inf }
  0xe4   :  { %102 = vmax.xlane.f32.xlu0 %v101_v8 }
  0xe8   :  { %105 = vmax.xlane.f32.xlu0 %v104_v9 }
 0x171   :  { %v103_v10 = vpop.xlane.xlu0 %102 }
 0x172   :  { %v107_v11 = vsub.f32 %v98_v6, %v103_v10 }
 0x174   :  { %v109_v12 = vmul.f32 1.442695, %v107_v11 }
 0x175   :  { %v106_v13 = vpop.xlane.xlu0 %105 }
 0x176   :  { %257 = vpow2.f32 %v109_v12  ;;  %v108_v14 = vsub.f32 %v99_v7, %v106_v13 }
 0x178   :  { %v111_v15 = vmul.f32 1.442695, %v108_v14 }
 0x17a   :  { %259 = vpow2.f32 %v111_v15 }
 0x180   :  { %v258_v16 = vpop.eup %257 }
 0x181   :  { %v113_v17 = vsel %vm100_vm2, %v258_v16, 0.0 }
 0x182   :  { %114 = vadd.xlane.f32.xlu1 %v113_v17 }
 0x184   :  { %v260_v18 = vpop.eup %259 }
 0x185   :  { %v116_v19 = vsel %vm100_vm2, %v260_v18, 0.0 }
 0x186   :  { %117 = vadd.xlane.f32.xlu1 %v116_v19 }
 0x20f   :  { %v115_v22 = vpop.xlane.xlu1 %114 }
 0x210   :  { %261 = vrcp.f32 %v115_v22 }
 0x213   :  { %v118_v23 = vpop.xlane.xlu1 %117 }
 0x214   :  { %263 = vrcp.f32 %v118_v23 }
 0x21a   :  { %v262_v24 = vpop.eup %261 }
 0x21b   :  { %v121_v25 = vmul.f32 %v262_v24, %v258_v16 }
 0x21d   :  { %123 = vst.msk [vmem:[#allocation2] sm:$0xff] %vm100_vm2, %v121_v25 }
 0x21e   :  { %v264_v26 = vpop.eup %263 }
 0x21f   :  { %v122_v27 = vmul.f32 %v264_v26, %v260_v18 }
 0x221   :  { %124 = vst.msk [vmem:[#allocation2 + $0x8] sm:$0xff] %vm100_vm2, %v122_v27 }
 0x222   :  { %276 = shalt.err (!%p273_p4)
}
 0x223   :  { %s277_s24 = scalar_lea.hbm %s355_s2, 256 }
 0x224   :  { %p278_p5 = scmp.ne.s32.totalorder %s355_s2, %s277_s24  ;;  %p281_p6 = scmp.lt.u32.totalorder %s277_s24, %s355_s2 }
 0x226   :  { %p283_p7 = pnand %p281_p6, %p278_p5 }
 0x228   :  { %286 = shalt.err (!%p283_p7)
}
 0x229   :  { %s290_s29 = smov 128   ;;  %s291_s30 = smov 8  }
 0x22a   :  { %214 = dma.vmem_to_hbm [thread:$0]  %s209_s21, 256, %s355_s2, [#allocation3], %s290_s29, %s290_s29, %s291_s30  }
 0x22b   :  { %287 = dma.done.wait [#allocation3], 256  }
 0x22c   :  { %288 = vsyncadd [#allocation3], 4294967040 }
 0x22d   :  { %222 = vsyncpa [#allocation3], 1 }

</bundles_post_ra>
